<compile_context>
chip_gen: v5e
topology: v5e:2x2
jax: 0.10.0
libtpu: 0.0.40
codegen_flags: <defaults>
</compile_context>

<pallas_src>
import jax
import jax.numpy as jnp
from jax.experimental import pallas as pl
from jax.experimental.pallas import tpu as pltpu

_N_OUT = 101     # 10 single digits + 90 pairs + 1 absent
_N_PAD = 128     # lane-dense output width
_MIN_TB = 256    # DMA-efficient minimum batch tile (when B allows)
_MAX_TB = 2048   # diminishing returns / VMEM sanity cap


# --------------------------------------------------------------------------
# Kernels
# --------------------------------------------------------------------------
def _gemm_bias_kernel(x_ref, w_ref, b_ref, out_ref):
    # Single MXU matmul + VPU bias add, one full-width (128-lane) store.
    out_ref[...] = (
        jnp.dot(x_ref[...], w_ref[...], preferred_element_type=jnp.float32)
        + b_ref[...]
    )


def _gemm_bias_ktiled_kernel(x_ref, w_ref, b_ref, out_ref, acc_ref):
    k = pl.program_id(1)

    @pl.when(k == 0)
    def _():
        acc_ref[...] = jnp.zeros_like(acc_ref)

    acc_ref[...] += jnp.dot(x_ref[...], w_ref[...],
                            preferred_element_type=jnp.float32)

    @pl.when(k == pl.num_programs(1) - 1)
    def _():
        out_ref[...] = acc_ref[...] + b_ref[...]


# --------------------------------------------------------------------------
# Parameter fusion (always in f32)
# --------------------------------------------------------------------------
def _fuse_params(params, embedding_type, embed_dim):
    """Fold position embeddings, position biases, digit/absent classifiers and
    the tens/ones gathers into a single (D, 128) weight and (1, 128) bias."""
    wd = jnp.asarray(params['digit_weight'], jnp.float32)          # (10, D)
    wa = jnp.asarray(params['absent_weight'], jnp.float32)         # (1, D)
    ba = jnp.asarray(params['absent_bias'], jnp.float32).reshape(1)
    pe = jnp.asarray(params['position_embeddings'], jnp.float32)   # (3, D)
    pb = jnp.broadcast_to(
        jnp.asarray(params['position_biases'], jnp.float32), (3, 10))

    nums = jnp.arange(10, 100)
    tmap = jax.nn.one_hot(nums // 10, 10, dtype=jnp.float32).T     # (10, 90)
    omap = jax.nn.one_hot(nums % 10, 10, dtype=jnp.float32).T      # (10, 90)

    wd_t = wd.T                                                    # (D, 10)
    if embedding_type == 'multiplicative':
        # (x * pe_p) @ wd.T == x @ (pe_p[:, None] * wd.T)
        w_pos = pe[:, :, None] * wd_t[None, :, :]                  # (3, D, 10)
        b_pos = pb
    elif embedding_type == 'additive':
        # (x + pe_p) @ wd.T == x @ wd.T + pe_p @ wd.T
        w_pos = jnp.broadcast_to(wd_t[None], (3, embed_dim, 10))
        b_pos = pb + pe @ wd_t
    else:
        raise ValueError(f"unknown embedding_type: {embedding_type}")

    w_single, w_tens, w_ones = w_pos[0], w_pos[1], w_pos[2]
    b_single, b_tens, b_ones = b_pos[0], b_pos[1], b_pos[2]

    # number_logits[:, 10:] = tens[:, tens_idx] + ones[:, ones_idx]
    w_pair = w_tens @ tmap + w_ones @ omap                         # (D, 90)
    b_pair = b_tens @ tmap + b_ones @ omap                         # (90,)

    w_fused = jnp.concatenate([w_single, w_pair, wa.T], axis=1)    # (D, 101)
    b_fused = jnp.concatenate([b_single, b_pair, ba], axis=0)      # (101,)

    w_fused = jnp.pad(w_fused, ((0, 0), (0, _N_PAD - _N_OUT)))
    b_fused = jnp.pad(b_fused, (0, _N_PAD - _N_OUT)).reshape(1, _N_PAD)
    return w_fused, b_fused


# --------------------------------------------------------------------------
# Tiling / VMEM budgeting
# --------------------------------------------------------------------------
def _vmem_budget_bytes():
    """(usable scoped-VMEM budget, physical capacity guess) per generation."""
    cap = 64 * 1024 * 1024
    try:
        cap = int(pltpu.get_tpu_info().vmem_capacity_bytes)
    except Exception:
        pass
    if cap <= 64 * 1024 * 1024:
        # v7x-class (64 MiB / TC): leave headroom for compiler scratch / sems.
        return min(cap - (14 << 20), 50 << 20), cap
    # v5e / v6e (128 MiB): allow large tiles, keep ~28 MiB headroom.
    return min(cap - (28 << 20), 100 << 20), cap


def _choose_tiles(B, D, itemsize, budget, granule, block_k=None):
    """Pick (batch_tile, k_tile) so the double-buffered x stream + resident
    weight fit the per-generation VMEM budget."""
    slack = 1 << 20

    def max_rows(bk, ktiled):
        w_bufs = 2 if ktiled else 1        # resident weight is single-buffered
        fixed = w_bufs * bk * _N_PAD * itemsize + 2 * _N_PAD * 4 + slack
        per_row = (2 * bk * itemsize                     # double-buffered x
                   + 2 * _N_PAD * 4                      # double-buffered out
                   + (_N_PAD * 4 if ktiled else 0))      # f32 accumulator
        return max((budget - fixed) // per_row, 0)

    def to_tile(rows):
        if rows >= B:
            return B                       # one full-dim block (always legal)
        rows = min(int(rows), _MAX_TB)
        return max(granule, (rows // granule) * granule)

    if block_k is not None and int(block_k) < D:
        bk = int(block_k)
        assert D % bk == 0 and bk % 128 == 0, \
            "block_k must be a 128-multiple divisor of D"
        return to_tile(max_rows(bk, True)), bk

    rows = max_rows(D, False)
    if rows >= min(B, _MIN_TB):
        return to_tile(rows), D

    # K-tile so the batch tile stays DMA-efficient (large D on v7x).
    if D % 128 == 0:
        m = D // 128
        for d in sorted((d for d in range(1, m) if m % d == 0), reverse=True):
            bk = 128 * d
            rows = max_rows(bk, True)
            if rows >= min(B, _MIN_TB):
                return to_tile(rows), bk

    # Last resort: small batch tile over full D (may spill at extreme D).
    return to_tile(min(B, _MIN_TB)), D


# --------------------------------------------------------------------------
# Wrapper
# --------------------------------------------------------------------------
def tied_digit_aware_classifier(x, params, *, embedding_type='multiplicative',
                                compute_dtype=None, block_k=None,
                                padded_output=False):
    """x: (B, D). Returns (B, 101) f32 logits matching the PyTorch forward
    (or the lane-padded (B, 128) slab when padded_output=True)."""
    B, D = x.shape

    # Stream dtype follows x (bf16 in -> bf16 stream); never cast x here --
    # a wrapper-side astype is its own HBM pass and negates the saving.
    if compute_dtype is None:
        compute_dtype = x.dtype if x.dtype in (jnp.bfloat16, jnp.float32) \
            else jnp.float32
    compute_dtype = jnp.dtype(compute_dtype)
    if x.dtype != compute_dtype:
        x = x.astype(compute_dtype)   # only on explicit user request

    w_fused, b_fused = _fuse_params(params, embedding_type, D)  # f32 fusion
    w_fused = w_fused.astype(compute_dtype)
    b_fused = b_fused.astype(jnp.float32)

    itemsize = compute_dtype.itemsize
    granule = max(8, 32 // itemsize)          # 8 f32, 16 bf16, 32 int8/fp8
    budget, cap = _vmem_budget_bytes()
    tb, bk = _choose_tiles(B, D, itemsize, budget, granule, block_k=block_k)
    ktiled = bk < D
    nk = D // bk if ktiled else 1
    grid_b = pl.cdiv(B, tb)                   # ragged final block handled by Pallas

    vmem_needed = (2 * tb * bk * itemsize
                   + 2 * tb * _N_PAD * 4
                   + bk * _N_PAD * itemsize
                   + 2 * _N_PAD * 4
                   + (tb * _N_PAD * 4 if ktiled else 0)
                   + (1 << 20))
    vmem_limit = int(min(vmem_needed + bk * _N_PAD * itemsize + (4 << 20),
                         cap - (6 << 20)))
    vmem_limit = max(vmem_limit, 32 << 20)

    cost = pl.CostEstimate(
        flops=2 * B * D * _N_PAD,
        transcendentals=0,
        bytes_accessed=(B * D * itemsize
                        + D * _N_PAD * itemsize
                        + B * _N_PAD * 4),
    )

    def _call(single_buffer):
        const_kw = ({"pipeline_mode": pl.Buffered(1)} if single_buffer else {})
        if not ktiled:
            grid = (grid_b,)
            in_specs = [
                pl.BlockSpec((tb, D), lambda i: (i, 0)),                 # x stream
                pl.BlockSpec((D, _N_PAD), lambda i: (0, 0), **const_kw),  # resident W
                pl.BlockSpec((1, _N_PAD), lambda i: (0, 0), **const_kw),  # resident b
            ]
            out_specs = pl.BlockSpec((tb, _N_PAD), lambda i: (i, 0))
            scratch = []
            kern = _gemm_bias_kernel
            sem = ("parallel",)
        else:
            grid = (grid_b, nk)
            in_specs = [
                pl.BlockSpec((tb, bk), lambda i, k: (i, k)),              # x stream
                pl.BlockSpec((bk, _N_PAD), lambda i, k: (k, 0)),          # W stream (K)
                pl.BlockSpec((1, _N_PAD), lambda i, k: (0, 0), **const_kw),
            ]
            out_specs = pl.BlockSpec((tb, _N_PAD), lambda i, k: (i, 0))
            scratch = [pltpu.VMEM((tb, _N_PAD), jnp.float32)]
            kern = _gemm_bias_ktiled_kernel
            sem = ("parallel", "arbitrary")
        return pl.pallas_call(
            kern,
            out_shape=jax.ShapeDtypeStruct((B, _N_PAD), jnp.float32),
            grid=grid,
            in_specs=in_specs,
            out_specs=out_specs,
            scratch_shapes=scratch,
            compiler_params=pltpu.CompilerParams(
                dimension_semantics=sem,
                vmem_limit_bytes=vmem_limit),
            cost_estimate=cost,
        )(x, w_fused, b_fused)

    try:
        out = _call(single_buffer=True)
    except Exception:
        # pl.Buffered(1) unsupported on this jax version -> default buffering.
        out = _call(single_buffer=False)

    if padded_output:
        return out               # (B, 128) lane-padded; cols [101:128] are zero
    return out[:, :_N_OUT]       # (B, 101)


# --------------------------------------------------------------------------
# Pure-JAX reference (mirrors the PyTorch forward)
# --------------------------------------------------------------------------
def _reference(x, params, *, embedding_type='multiplicative'):
    pe = params['position_embeddings']
    pb = params['position_biases']
    wd = params['digit_weight']
    wa = params['absent_weight']
    ba = params['absent_bias']
    if embedding_type == 'additive':
        positioned = x[:, None, :] + pe[None, :, :]
    else:
        positioned = x[:, None, :] * pe[None, :, :]
    digit_logits = jnp.einsum('bpd,cd->bpc', positioned, wd) + pb[None, :, :]
    single, tens, ones = digit_logits[:, 0], digit_logits[:, 1], digit_logits[:, 2]
    absent = x @ wa.T + ba[None, :]
    nums = jnp.arange(10, 100)
    pairs = tens[:, nums // 10] + ones[:, nums % 10]
    return jnp.concatenate([single, pairs, absent], axis=1)


# --------------------------------------------------------------------------
# Self-test
# --------------------------------------------------------------------------
if __name__ == "__main__":
    def make_params(key, D, embedding_type, per_digit_bias):
        kwd, kwa, kba, kpe = jax.random.split(key, 4)
        if embedding_type == 'additive':
            pe = jax.random.normal(kpe, (3, D), jnp.float32)
        else:
            pe = 1.0 + 0.1 * jax.random.normal(kpe, (3, D), jnp.float32)
        pb = (jnp.full((3, 10), 0.01, jnp.float32) if per_digit_bias
              else jnp.zeros((3, 1), jnp.float32))
        return {
            'digit_weight': jax.random.normal(kwd, (10, D), jnp.float32) * 0.1,
            'absent_weight': jax.random.normal(kwa, (1, D), jnp.float32) * 0.1,
            'absent_bias': jax.random.normal(kba, (1,), jnp.float32) * 0.1,
            'position_biases': pb,
            'position_embeddings': pe,
        }

    key = jax.random.PRNGKey(0)
    ok = True

    # Cases 1-2: small shapes, single-K-block fast path, both embedding types.
    B, D = 2, 32
    kx, kp, krest = jax.random.split(key, 3)
    x = jax.random.normal(kx, (B, D), jnp.float32)
    for et, pdb in [('multiplicative', False), ('additive', True)]:
        params = make_params(kp, D, et, pdb)
        out = jax.block_until_ready(
            tied_digit_aware_classifier(x, params, embedding_type=et))
        ref = _reference(x, params, embedding_type=et)
        ok &= out.shape == (B, _N_OUT)
        ok &= bool(jnp.allclose(out, ref, atol=1e-4, rtol=1e-4))

    # Case 3: force the K-tiled accumulator path (D=256, block_k=128 -> 2 K steps).
    B2, D2 = 4, 256
    kx2, kp2 = jax.random.split(krest)
    x2 = jax.random.normal(kx2, (B2, D2), jnp.float32)
    params2 = make_params(kp2, D2, 'multiplicative', True)
    out2 = jax.block_until_ready(
        tied_digit_aware_classifier(x2, params2,
                                    embedding_type='multiplicative',
                                    block_k=128))
    ref2 = _reference(x2, params2, embedding_type='multiplicative')
    ok &= out2.shape == (B2, _N_OUT)
    ok &= bool(jnp.allclose(out2, ref2, atol=1e-4, rtol=1e-4))

    assert ok
    print("KERNEL_OK")
</pallas_src>

<mosaic_0001>
module attributes {stable_mosaic.version = 11 : i64} {
  func.func @_gemm_bias_kernel(%arg0: i32, %arg1: memref<2x32xf32, #tpu.memory_space<vmem>>, %arg2: memref<32x128xf32, #tpu.memory_space<vmem>>, %arg3: memref<1x128xf32, #tpu.memory_space<vmem>>, %arg4: memref<2x128xf32, #tpu.memory_space<vmem>>) attributes {dimension_semantics = [#tpu.dimension_semantics<parallel>], iteration_bounds = array<i64: 1>, scalar_prefetch = 0 : i64, scratch_operands = 0 : i64, tpu.core_type = #tpu.core_type<tc>, window_params = [{transform_indices = @transform_0, window_bounds = array<i64: 2, 32>}, {pipeline_mode = #tpu.pipeline_mode<synchronous>, transform_indices = @transform_1, window_bounds = array<i64: 32, 128>}, {pipeline_mode = #tpu.pipeline_mode<synchronous>, transform_indices = @transform_2, window_bounds = array<i64: 1, 128>}, {transform_indices = @transform_3, window_bounds = array<i64: 2, 128>}]} {
    %c0 = arith.constant 0 : index
    %c0_0 = arith.constant 0 : index
    %0 = vector.load %arg1[%c0, %c0_0] : memref<2x32xf32, #tpu.memory_space<vmem>>, vector<2x32xf32>
    %c0_1 = arith.constant 0 : index
    %c0_2 = arith.constant 0 : index
    %1 = vector.load %arg2[%c0_1, %c0_2] : memref<32x128xf32, #tpu.memory_space<vmem>>, vector<32x128xf32>
    %cst = arith.constant dense<0.000000e+00> : vector<2x128xf32>
    %2 = tpu.matmul %0, %1, %cst {dimension_numbers = #tpu.dot_dimension_numbers<[1], [0], [0], [1], [0, 0, 1, 1], [], []>} : vector<2x32xf32>, vector<32x128xf32>, vector<2x128xf32> -> vector<2x128xf32>
    %c0_3 = arith.constant 0 : index
    %c0_4 = arith.constant 0 : index
    %3 = vector.load %arg3[%c0_3, %c0_4] : memref<1x128xf32, #tpu.memory_space<vmem>>, vector<1x128xf32>
    %4 = vector.broadcast %3 : vector<1x128xf32> to vector<2x128xf32>
    %5 = arith.addf %2, %4 : vector<2x128xf32>
    %c0_5 = arith.constant 0 : index
    %c0_6 = arith.constant 0 : index
    %6 = vector.load %arg4[%c0_5, %c0_6] : memref<2x128xf32, #tpu.memory_space<vmem>>, vector<2x128xf32>
    tpu.vector_store %arg4[%c0_5, %c0_6], %5 {strides = array<i32>} : memref<2x128xf32, #tpu.memory_space<vmem>>, vector<2x128xf32>,
    return
  }
  func.func @transform_0(%arg0: i32) -> (i32, i32) {
    %c0_i32 = arith.constant 0 : i32
    %c0_i32_0 = arith.constant 0 : i32
    return %arg0, %c0_i32 : i32, i32
  }
  func.func @transform_1(%arg0: i32) -> (i32, i32) {
    %c0_i32 = arith.constant 0 : i32
    %c0_i32_0 = arith.constant 0 : i32
    %c0_i32_1 = arith.constant 0 : i32
    return %c0_i32, %c0_i32_0 : i32, i32
  }
  func.func @transform_2(%arg0: i32) -> (i32, i32) {
    %c0_i32 = arith.constant 0 : i32
    %c0_i32_0 = arith.constant 0 : i32
    %c0_i32_1 = arith.constant 0 : i32
    return %c0_i32, %c0_i32_0 : i32, i32
  }
  func.func @transform_3(%arg0: i32) -> (i32, i32) {
    %c0_i32 = arith.constant 0 : i32
    %c0_i32_0 = arith.constant 0 : i32
    return %arg0, %c0_i32 : i32, i32
  }
}

module attributes {stable_mosaic.version = 11 : i64} {
  func.func @_gemm_bias_kernel(%arg0: i32, %arg1: memref<2x32xf32, #tpu.memory_space<vmem>>, %arg2: memref<32x128xf32, #tpu.memory_space<vmem>>, %arg3: memref<1x128xf32, #tpu.memory_space<vmem>>, %arg4: memref<2x128xf32, #tpu.memory_space<vmem>>) attributes {dimension_semantics = [#tpu.dimension_semantics<parallel>], iteration_bounds = array<i64: 1>, scalar_prefetch = 0 : i64, scratch_operands = 0 : i64, tpu.core_type = #tpu.core_type<tc>, window_params = [{transform_indices = @transform_0, window_bounds = array<i64: 2, 32>}, {pipeline_mode = #tpu.pipeline_mode<synchronous>, transform_indices = @transform_1, window_bounds = array<i64: 32, 128>}, {pipeline_mode = #tpu.pipeline_mode<synchronous>, transform_indices = @transform_2, window_bounds = array<i64: 1, 128>}, {transform_indices = @transform_3, window_bounds = array<i64: 2, 128>}]} {
    %c0 = arith.constant 0 : index
    %c0_0 = arith.constant 0 : index
    %0 = vector.load %arg1[%c0, %c0_0] : memref<2x32xf32, #tpu.memory_space<vmem>>, vector<2x32xf32>
    %c0_1 = arith.constant 0 : index
    %c0_2 = arith.constant 0 : index
    %1 = vector.load %arg2[%c0_1, %c0_2] : memref<32x128xf32, #tpu.memory_space<vmem>>, vector<32x128xf32>
    %cst = arith.constant dense<0.000000e+00> : vector<2x128xf32>
    %2 = tpu.matmul %0, %1, %cst {dimension_numbers = #tpu.dot_dimension_numbers<[1], [0], [0], [1], [0, 0, 1, 1], [], []>} : vector<2x32xf32>, vector<32x128xf32>, vector<2x128xf32> -> vector<2x128xf32>
    %c0_3 = arith.constant 0 : index
    %c0_4 = arith.constant 0 : index
    %3 = vector.load %arg3[%c0_3, %c0_4] : memref<1x128xf32, #tpu.memory_space<vmem>>, vector<1x128xf32>
    %4 = vector.broadcast %3 : vector<1x128xf32> to vector<2x128xf32>
    %5 = arith.addf %2, %4 : vector<2x128xf32>
    %c0_5 = arith.constant 0 : index
    %c0_6 = arith.constant 0 : index
    %6 = vector.load %arg4[%c0_5, %c0_6] : memref<2x128xf32, #tpu.memory_space<vmem>>, vector<2x128xf32>
    tpu.vector_store %arg4[%c0_5, %c0_6], %5 {strides = array<i32>} : memref<2x128xf32, #tpu.memory_space<vmem>>, vector<2x128xf32>,
    return
  }
  func.func @transform_0(%arg0: i32) -> (i32, i32) {
    %c0_i32 = arith.constant 0 : i32
    %c0_i32_0 = arith.constant 0 : i32
    return %arg0, %c0_i32 : i32, i32
  }
  func.func @transform_1(%arg0: i32) -> (i32, i32) {
    %c0_i32 = arith.constant 0 : i32
    %c0_i32_0 = arith.constant 0 : i32
    %c0_i32_1 = arith.constant 0 : i32
    return %c0_i32, %c0_i32_0 : i32, i32
  }
  func.func @transform_2(%arg0: i32) -> (i32, i32) {
    %c0_i32 = arith.constant 0 : i32
    %c0_i32_0 = arith.constant 0 : i32
    %c0_i32_1 = arith.constant 0 : i32
    return %c0_i32, %c0_i32_0 : i32, i32
  }
  func.func @transform_3(%arg0: i32) -> (i32, i32) {
    %c0_i32 = arith.constant 0 : i32
    %c0_i32_0 = arith.constant 0 : i32
    return %arg0, %c0_i32 : i32, i32
  }
}

</mosaic_0001>

<bundles_post_ra>
// kernel: tpu_custom_call.1
= control target key start
LH: loop header
LB: loop body
LE: loop exit
PB: predicated region body
PF: predicated region fallthrough
CT: control target
= control target key end

     0   :  { %8 = vsyncpa [#allocation3], 0  ;;  %s219_s0 = inlined_call_operand.hbm [shape: f32[2,32], index: 0, kind: input, shape index: {}]   ;;  %s220_s1 = inlined_call_operand.hbm [shape: f32[32,128], index: 1, kind: input, shape index: {}]   ;;  %s221_s2 = inlined_call_operand.vmem [shape: f32[1,128], index: 2, kind: input, shape index: {}]   ;;  %s222_s3 = inlined_call_operand.hbm [shape: f32[2,128], index: 3, kind: output, shape index: {}]  }
   0x1   :  { %9 = vsyncpa [#allocation6], 0 }
   0x2   :  { %10 = vsyncpa [#allocation4], 0  ;;  %s16_s14 = sshll.u32 %s219_s0, 4  ;;  %s182_s15 = smov [#allocation2]   ;;  %s17_s14 = int_to_ptr.hbm [resolvable:$true] %s16_s14 }
   0x3   :  { %s18_s16 = sshll.u32 %s182_s15, 4  ;;  %s26_s19 = sshll.u32 %s220_s1, 4  ;;  %s19_s16 = int_to_ptr.vmem [resolvable:$true] %s18_s16  ;;  %s27_s19 = int_to_ptr.hbm [resolvable:$true] %s26_s19 }
   0x4   :  { %21 = dma.hbm_to_vmem [thread:$0]  %s17_s14, 32, %s19_s16, [#allocation3]  }
   0x5   :  { %s183_s20 = smov [#allocation5]   ;;  %s184_s22 = smov 128  }
   0x6   :  { %s28_s21 = sshll.u32 %s183_s20, 4  ;;  %s185_s23 = smov 8   ;;  %s29_s21 = int_to_ptr.vmem [resolvable:$true] %s28_s21 }
   0x7   :  { %34 = dma.hbm_to_vmem [thread:$0]  %s27_s19, 512, %s29_s21, [#allocation6], %s184_s22, %s184_s22, %s185_s23  }
   0x8   :  { %176 = dma.done.wait [#allocation3], 32  }
   0x9   :  { %177 = vsyncadd [#allocation3], 4294967264 }
   0xa   :  { %178 = dma.done.wait [#allocation6], 512  }
   0xb   :  { %179 = vsyncadd [#allocation6], 4294966784  ;;  %v49_v0 = vld [vmem:[#allocation5 + $0x18] sm:$0xff]  ;;  %v48_v1 = vld [vmem:[#allocation5 + $0x10] sm:$0xff]  ;;  %vm54_vm0 = vcmask 261120   ;;  %s186_s24 = smov [#allocation7]  }
   0xc   :  { %70 = vmatpush.msra.mxu0 %v49_v0  ;;  %v47_v2 = vld [vmem:[#allocation5 + $0x8] sm:$0xff]  ;;  %v46_v3 = vld [vmem:[#allocation5] sm:$0xff]  ;;  %v45_v4 = vld [vmem:[#allocation2] sm:$0x3]  ;;  %s84_s25 = sshll.u32 %s186_s24, 4  ;;  %s86_s28 = sshll.u32 %s222_s3, 4  ;;  %s85_s25 = int_to_ptr.vmem [resolvable:$true] %s84_s25  ;;  %s87_s28 = int_to_ptr.hbm [resolvable:$true] %s86_s28 }
   0xd   :  { %v103_v5 = vld [vmem:[%s221_s2] ss:$0 sm:$0xff] }
   0xe   :  { %71 = vmatpush.msra.mxu0 %v48_v1 }
  0x10   :  { %72 = vmatpush.msra.mxu0 %v47_v2 }
  0x12   :  { %73 = vmatpush.msra.mxu0 %v46_v3 }
  0x13   :  { %97 = vmatmul.msk.f32.vlgmr.msra.gmra.mxu0 %vm54_vm0, %v45_v4 }
  0x90   :  { %v75_v6 = vpop.f32.mrf.mxu0 }
  0x91   :  { %v76_v7 = vadd.f32 %v103_v5, %v75_v6 }
  0x93   :  { %78 = vst [vmem:[#allocation7] sm:$0x3] %v76_v7 }
  0x94   :  { %89 = dma.vmem_to_hbm [thread:$0]  %s85_s25, 32, %s87_s28, [#allocation4]  }
  0x95   :  { %180 = dma.done.wait [#allocation4], 32  }
  0x96   :  { %181 = vsyncadd [#allocation4], 4294967264 }
  0x97   :  { %94 = vsyncpa [#allocation3], 1 }
  0x98   :  { %95 = vsyncpa [#allocation6], 1 }
  0x99   :  { %96 = vsyncpa [#allocation4], 1 }

// kernel: tpu_custom_call.1
= control target key start
LH: loop header
LB: loop body
LE: loop exit
PB: predicated region body
PF: predicated region fallthrough
CT: control target
= control target key end

     0   :  { %8 = vsyncpa [#allocation3], 0  ;;  %s219_s0 = inlined_call_operand.hbm [shape: f32[2,32], index: 0, kind: input, shape index: {}]   ;;  %s220_s1 = inlined_call_operand.hbm [shape: f32[32,128], index: 1, kind: input, shape index: {}]   ;;  %s221_s2 = inlined_call_operand.vmem [shape: f32[1,128], index: 2, kind: input, shape index: {}]   ;;  %s222_s3 = inlined_call_operand.hbm [shape: f32[2,128], index: 3, kind: output, shape index: {}]  }
   0x1   :  { %9 = vsyncpa [#allocation6], 0 }
   0x2   :  { %10 = vsyncpa [#allocation4], 0  ;;  %s16_s14 = sshll.u32 %s219_s0, 4  ;;  %s182_s15 = smov [#allocation2]   ;;  %s17_s14 = int_to_ptr.hbm [resolvable:$true] %s16_s14 }
   0x3   :  { %s18_s16 = sshll.u32 %s182_s15, 4  ;;  %s26_s19 = sshll.u32 %s220_s1, 4  ;;  %s19_s16 = int_to_ptr.vmem [resolvable:$true] %s18_s16  ;;  %s27_s19 = int_to_ptr.hbm [resolvable:$true] %s26_s19 }
   0x4   :  { %21 = dma.hbm_to_vmem [thread:$0]  %s17_s14, 32, %s19_s16, [#allocation3]  }
   0x5   :  { %s183_s20 = smov [#allocation5]   ;;  %s184_s22 = smov 128  }
   0x6   :  { %s28_s21 = sshll.u32 %s183_s20, 4  ;;  %s185_s23 = smov 8   ;;  %s29_s21 = int_to_ptr.vmem [resolvable:$true] %s28_s21 }
   0x7   :  { %34 = dma.hbm_to_vmem [thread:$0]  %s27_s19, 512, %s29_s21, [#allocation6], %s184_s22, %s184_s22, %s185_s23  }
   0x8   :  { %176 = dma.done.wait [#allocation3], 32  }
   0x9   :  { %177 = vsyncadd [#allocation3], 4294967264 }
   0xa   :  { %178 = dma.done.wait [#allocation6], 512  }
   0xb   :  { %179 = vsyncadd [#allocation6], 4294966784  ;;  %v49_v0 = vld [vmem:[#allocation5 + $0x18] sm:$0xff]  ;;  %v48_v1 = vld [vmem:[#allocation5 + $0x10] sm:$0xff]  ;;  %vm54_vm0 = vcmask 261120   ;;  %s186_s24 = smov [#allocation7]  }
   0xc   :  { %70 = vmatpush.msra.mxu0 %v49_v0  ;;  %v47_v2 = vld [vmem:[#allocation5 + $0x8] sm:$0xff]  ;;  %v46_v3 = vld [vmem:[#allocation5] sm:$0xff]  ;;  %v45_v4 = vld [vmem:[#allocation2] sm:$0x3]  ;;  %s84_s25 = sshll.u32 %s186_s24, 4  ;;  %s86_s28 = sshll.u32 %s222_s3, 4  ;;  %s85_s25 = int_to_ptr.vmem [resolvable:$true] %s84_s25  ;;  %s87_s28 = int_to_ptr.hbm [resolvable:$true] %s86_s28 }
   0xd   :  { %v103_v5 = vld [vmem:[%s221_s2] ss:$0 sm:$0xff] }
   0xe   :  { %71 = vmatpush.msra.mxu0 %v48_v1 }
  0x10   :  { %72 = vmatpush.msra.mxu0 %v47_v2 }
  0x12   :  { %73 = vmatpush.msra.mxu0 %v46_v3 }
  0x13   :  { %97 = vmatmul.msk.f32.vlgmr.msra.gmra.mxu0 %vm54_vm0, %v45_v4 }
  0x90   :  { %v75_v6 = vpop.f32.mrf.mxu0 }
  0x91   :  { %v76_v7 = vadd.f32 %v103_v5, %v75_v6 }
  0x93   :  { %78 = vst [vmem:[#allocation7] sm:$0x3] %v76_v7 }
  0x94   :  { %89 = dma.vmem_to_hbm [thread:$0]  %s85_s25, 32, %s87_s28, [#allocation4]  }
  0x95   :  { %180 = dma.done.wait [#allocation4], 32  }
  0x96   :  { %181 = vsyncadd [#allocation4], 4294967264 }
  0x97   :  { %94 = vsyncpa [#allocation3], 1 }
  0x98   :  { %95 = vsyncpa [#allocation6], 1 }
  0x99   :  { %96 = vsyncpa [#allocation4], 1 }

</bundles_post_ra>
